<compile_context>
chip_gen: v6e
topology: v6e:2x2x1
jax: 0.10.0
libtpu: 0.0.40
codegen_flags: <defaults>
</compile_context>

<pallas_src>
import math
from functools import reduce
from operator import mul

import jax
import jax.numpy as jnp
from jax.experimental import pallas as pl
from jax.experimental.pallas import tpu as pltpu  # noqa: F401  (kept for TPU backend)


def _prompt_identity_kernel(emb_ref, out_ref):
    # Single full-array tile; output aliases input, so this is an in-place
    # pass-through of the prompt parameter.
    out_ref[...] = emb_ref[...]


def visual_prompt_learner_forward(prompt_embeddings: jax.Array) -> jax.Array:
    """Pallas equivalent of VisualPromptLearner.forward(): returns the
    prompt embeddings via a single aliased, lane-dense identity kernel."""
    num_layers, num_tokens, hidden_size = prompt_embeddings.shape
    total = num_layers * num_tokens * hidden_size

    # Present a lane-dense 2-D slab to the kernel (last dim a multiple of 128
    # when possible); one block covers the entire tensor.
    if hidden_size % 128 == 0:
        flat_shape = (num_layers * num_tokens, hidden_size)
    elif total % 128 == 0:
        flat_shape = (total // 128, 128)
    else:
        # Full-array block still satisfies the tiling-constraint exception.
        flat_shape = (num_layers * num_tokens, hidden_size)

    flat = prompt_embeddings.reshape(flat_shape)

    out_flat = pl.pallas_call(
        _prompt_identity_kernel,
        out_shape=jax.ShapeDtypeStruct(flat_shape, flat.dtype),
        grid=(1,),
        in_specs=[pl.BlockSpec(flat_shape, lambda i: (0, 0))],
        out_specs=pl.BlockSpec(flat_shape, lambda i: (0, 0)),
        # Output buffer IS the input buffer: no extra HBM result allocation;
        # the "copy" degenerates to one round trip of a tiny slab through VMEM.
        input_output_aliases={0: 0},
    )(flat)

    return out_flat.reshape(num_layers, num_tokens, hidden_size)


def init_prompt_embeddings(key, num_layers, num_tokens, hidden_size,
                           dtype=jnp.float32):
    """Deterministic re-implementation of the module's __init__."""
    patch_size = 14
    val = math.sqrt(
        6.0 / float(3 * reduce(mul, (patch_size, patch_size), 1) + hidden_size)
    )
    return jax.random.uniform(
        key,
        (num_layers, num_tokens, hidden_size),
        dtype=dtype,
        minval=-val,
        maxval=val,
    )


if __name__ == "__main__":
    # Small shapes consistent with the module: a few transformer layers,
    # a handful of prompt tokens, modest hidden size.
    num_layers, num_tokens, hidden_size = 4, 8, 32

    key = jax.random.PRNGKey(0)
    prompt_embeddings = init_prompt_embeddings(
        key, num_layers, num_tokens, hidden_size
    )

    out = visual_prompt_learner_forward(prompt_embeddings)
    out = jax.block_until_ready(out)

    # Sanity check: forward() must return exactly the parameter.
    assert out.shape == (num_layers, num_tokens, hidden_size)
    assert out.dtype == prompt_embeddings.dtype
    assert bool(jnp.array_equal(out, prompt_embeddings))

    print("KERNEL_OK")
</pallas_src>

<mosaic_0001>
module attributes {stable_mosaic.version = 11 : i64} {
  func.func @_prompt_identity_kernel(%arg0: i32, %arg1: memref<8x128xf32, #tpu.memory_space<vmem>>, %arg2: memref<8x128xf32, #tpu.memory_space<vmem>>) attributes {dimension_semantics = [#tpu.dimension_semantics<arbitrary>], iteration_bounds = array<i64: 1>, scalar_prefetch = 0 : i64, scratch_operands = 0 : i64, tpu.core_type = #tpu.core_type<tc>, window_params = [{pipeline_mode = #tpu.pipeline_mode<synchronous>, transform_indices = @transform_0, window_bounds = array<i64: 8, 128>}, {pipeline_mode = #tpu.pipeline_mode<synchronous>, transform_indices = @transform_1, window_bounds = array<i64: 8, 128>}]} {
    %c0 = arith.constant 0 : index
    %c0_0 = arith.constant 0 : index
    %0 = vector.load %arg1[%c0, %c0_0] : memref<8x128xf32, #tpu.memory_space<vmem>>, vector<8x128xf32>
    %c0_1 = arith.constant 0 : index
    %c0_2 = arith.constant 0 : index
    %1 = vector.load %arg2[%c0_1, %c0_2] : memref<8x128xf32, #tpu.memory_space<vmem>>, vector<8x128xf32>
    tpu.vector_store %arg2[%c0_1, %c0_2], %0 {strides = array<i32>} : memref<8x128xf32, #tpu.memory_space<vmem>>, vector<8x128xf32>,
    return
  }
  func.func @transform_0(%arg0: i32) -> (i32, i32) {
    %c0_i32 = arith.constant 0 : i32
    %c0_i32_0 = arith.constant 0 : i32
    %c0_i32_1 = arith.constant 0 : i32
    return %c0_i32, %c0_i32_0 : i32, i32
  }
  func.func @transform_1(%arg0: i32) -> (i32, i32) {
    %c0_i32 = arith.constant 0 : i32
    %c0_i32_0 = arith.constant 0 : i32
    %c0_i32_1 = arith.constant 0 : i32
    return %c0_i32, %c0_i32_0 : i32, i32
  }
}

</mosaic_0001>

<bundles_post_ra>
// kernel: tpu_custom_call.1
= control target key start
LH: loop header
LB: loop body
LE: loop exit
PB: predicated region body
PF: predicated region fallthrough
CT: control target
= control target key end

     0   :  { %6 = vsyncpa [#allocation3], 0  ;;  %s102_s0 = inlined_call_operand.hbm [shape: f32[8,128], index: 0, kind: input, shape index: {}, may-alias: {0,1}]   ;;  %s103_s1 = inlined_call_operand.hbm [shape: f32[8,128], index: 1, kind: output, shape index: {}, may-alias: {0,1}]  }
   0x1   :  { %7 = vsyncpa [#allocation4], 0  ;;  %s84_s6 = smov [#allocation2]  }
   0x2   :  { %s14_s7 = sshll.u32 %s84_s6, 4  ;;  %s15_s7 = int_to_ptr.vmem [resolvable:$true] %s14_s7 }
   0x3   :  { %s48_s8 = scalar_lea.vmem %s15_s7, 128  ;;  %p53_p1 = scmp.lt.s32.totalorder %s15_s7, %s15_s7 }
   0x4   :  { %p49_p0 = scmp.ne.s32.totalorder %s15_s7, %s48_s8  ;;  %p54_p2 = scmp.lt.s32.totalorder %s48_s8, %s48_s8 }
   0x6   :  { %p55_p3 = por %p54_p2, %p53_p1 }
   0x8   :  { %p56_p4 = pnand %p55_p3, %p49_p0 }
   0xa   :  { %59 = shalt.err (!%p56_p4)
}
   0xb   :  { %17 = dma.hbm_to_vmem [thread:$0]  %s102_s0, 128, %s15_s7, [#allocation3]  }
   0xc   :  { %80 = dma.done.wait [#allocation3], 128  }
   0xd   :  { %81 = vsyncadd [#allocation3], 4294967168  ;;  %s85_s11 = smov [#allocation5]   ;;  %v21_v0 = vld [vmem:[#allocation2] sm:$0xff] }
   0xe   :  { %s29_s12 = sshll.u32 %s85_s11, 4  ;;  %22 = vst [vmem:[#allocation5] sm:$0xff] %v21_v0  ;;  %s30_s12 = int_to_ptr.vmem [resolvable:$true] %s29_s12 }
   0xf   :  { %s60_s13 = scalar_lea.vmem %s30_s12, 128  ;;  %p65_p6 = scmp.lt.s32.totalorder %s30_s12, %s30_s12 }
  0x10   :  { %p61_p5 = scmp.ne.s32.totalorder %s30_s12, %s60_s13  ;;  %p66_p7 = scmp.lt.s32.totalorder %s60_s13, %s60_s13 }
  0x12   :  { %p67_p8 = por %p66_p7, %p65_p6 }
  0x14   :  { %p68_p9 = pnand %p67_p8, %p61_p5 }
  0x16   :  { %71 = shalt.err (!%p68_p9)
}
  0x17   :  { %32 = dma.vmem_to_hbm [thread:$0]  %s30_s12, 128, %s103_s1, [#allocation4]  }
  0x18   :  { %82 = dma.done.wait [#allocation4], 128  }
  0x19   :  { %83 = vsyncadd [#allocation4], 4294967168 }
  0x1a   :  { %36 = vsyncpa [#allocation3], 1 }
  0x1b   :  { %37 = vsyncpa [#allocation4], 1 }

</bundles_post_ra>
